<compile_context>
chip_gen: v7x
topology: tpu7x:2x2x1
jax: 0.10.0
libtpu: 0.0.40
codegen_flags: <defaults>
</compile_context>

<pallas_src>
import functools

import jax
import jax.numpy as jnp
from jax.experimental import pallas as pl
from jax.experimental.pallas import tpu as pltpu


# ------------------------------ tiling helpers ------------------------------

def _tile(dim, target, align):
    """Largest `align`-aligned tile <= target that evenly divides `dim`
    (falls back to the full dimension)."""
    if dim <= target:
        return dim
    t = (target // align) * align
    while t >= align:
        if dim % t == 0:
            return t
        t -= align
    return dim


def _lane_tile(dim, target=512):
    return _tile(dim, target, 128)


def _row_tile(dim, target):
    return _tile(dim, target, 8)


def _vmem_limit(bytes_needed):
    # Floor at 32 MiB (>= default scoped limit), cap at 64 MiB (v7x physical).
    return int(min(max(2 * bytes_needed + (1 << 20), 32 << 20), 64 << 20))


# --------------------------- packed (grouped) linear --------------------------

def _packed_linear_kernel(x_ref, w_ref, b_ref, o_ref):
    # x: (1, tn, Cin)   w: (1, Cin, tc)   b: (1, 1, tc)   o: (1, 1, tn, tc)
    y = jnp.dot(x_ref[0], w_ref[0], preferred_element_type=jnp.float32)
    o_ref[0, 0] = (y + b_ref[0].astype(jnp.float32)).astype(o_ref.dtype)


def packed_linear(x, w, b):
    """y[g] = x @ w[g] + b[g].

    x: (B, N, Cin)   w: (G, Cin, Cper)   b: (G, 1, Cper)  ->  (G, B, N, Cper)

    One pallas_call computes all G projections (activation read from HBM once).
    Grid order is chosen per call so the operand that would otherwise be
    re-fetched the most stays resident (weight-outer vs activation-outer).
    """
    B, N, Cin = x.shape
    G, _, Cper = w.shape
    tn = _row_tile(N, 512)
    tc = _lane_tile(Cper, 512)
    nj, nc = N // tn, Cper // tc
    esz = x.dtype.itemsize
    act_bytes = B * N * Cin * esz
    w_bytes = G * Cin * Cper * w.dtype.itemsize
    # weight-outer re-reads activations (G*nc) times; act-outer re-reads
    # weights (B*nj) times.
    weight_outer = (G * nc * act_bytes + w_bytes) <= (act_bytes + B * nj * w_bytes)
    if weight_outer:
        grid = (G, nc, B, nj)
        x_spec = pl.BlockSpec((1, tn, Cin), lambda g, c, i, j: (i, j, 0))
        w_spec = pl.BlockSpec((1, Cin, tc), lambda g, c, i, j: (g, 0, c))
        b_spec = pl.BlockSpec((1, 1, tc), lambda g, c, i, j: (g, 0, c))
        o_spec = pl.BlockSpec((1, 1, tn, tc), lambda g, c, i, j: (g, i, j, c))
    else:
        grid = (B, nj, G, nc)
        x_spec = pl.BlockSpec((1, tn, Cin), lambda i, j, g, c: (i, j, 0))
        w_spec = pl.BlockSpec((1, Cin, tc), lambda i, j, g, c: (g, 0, c))
        b_spec = pl.BlockSpec((1, 1, tc), lambda i, j, g, c: (g, 0, c))
        o_spec = pl.BlockSpec((1, 1, tn, tc), lambda i, j, g, c: (g, i, j, c))

    block_bytes = 2 * esz * (tn * Cin + Cin * tc + tc + tn * tc) + 4 * tn * tc
    ce = pl.CostEstimate(
        flops=2 * B * N * Cin * G * Cper,
        transcendentals=0,
        bytes_accessed=esz * (B * N * Cin + G * Cin * Cper + G * B * N * Cper))
    return pl.pallas_call(
        _packed_linear_kernel,
        out_shape=jax.ShapeDtypeStruct((G, B, N, Cper), x.dtype),
        grid=grid,
        in_specs=[x_spec, w_spec, b_spec],
        out_specs=o_spec,
        compiler_params=pltpu.CompilerParams(
            dimension_semantics=("parallel",) * 4,
            vmem_limit_bytes=_vmem_limit(block_bytes)),
        cost_estimate=ce,
    )(x, w, b)


# ------------------------------- attention core -------------------------------

def _attn_kernel(q_ref, k_ref, v_ref, o_ref, *, scale, num_heads):
    # q: (1, 1, tq, C)   k/v: (1, 1, S, C)   o: (1, tq, C).  Heads packed in C.
    q = q_ref[0, 0]
    k = k_ref[0, 0]
    v = v_ref[0, 0]
    C = q.shape[-1]
    D = C // num_heads
    for h in range(num_heads):                      # static unroll over heads
        lo = h * D
        # Pre-scale q on the small (tq, D) tile instead of the (tq, S) logits.
        qh = (q[:, lo:lo + D] * scale).astype(q.dtype)
        kh = k[:, lo:lo + D]
        vh = v[:, lo:lo + D]
        # q @ k^T without materializing a transpose: contract last dims.
        s = jax.lax.dot_general(
            qh, kh, (((1,), (1,)), ((), ())),
            preferred_element_type=jnp.float32)                    # (tq, S) f32
        m = jnp.max(s, axis=-1, keepdims=True)
        p = jnp.exp(s - m)            # TODO(synk): bf16 exp on v6e/v7x
        l = jnp.sum(p, axis=-1, keepdims=True)
        oh = jnp.dot(p.astype(vh.dtype), vh,
                     preferred_element_type=jnp.float32)           # (tq, D) f32
        # Fold the softmax normalization into the small output tile; approx
        # reciprocal runs on the (otherwise idle) EUP slot.
        oh = oh * pl.reciprocal(l, approx=True)
        # Per-head direct store: no concatenate, one head accumulator live.
        o_ref[0, :, lo:lo + D] = oh.astype(o_ref.dtype)


def attention(q_pack, k_pack, v_pack, qi, ki, vi, *, scale, num_heads,
              tq_target=256):
    """Multi-head attention on packed-head tensors.

    q_pack: (Gq, B, N, C); k_pack/v_pack: (Gk, B, S, C) — all three may alias
    the same packed qkv tensor, selected via the leading indices qi/ki/vi.
    Grid tiled over (batch, query tiles): VMEM capped by tq and >= 2 parallel
    grid units for megacore sharding.
    """
    # TODO(synk): flash-style online softmax over KV tiles for very long S.
    _, B, N, C = q_pack.shape
    S = k_pack.shape[2]
    D = C // num_heads
    tq = _row_tile(N, tq_target)
    nj = N // tq
    esz = q_pack.dtype.itemsize
    kern = functools.partial(_attn_kernel, scale=scale, num_heads=num_heads)
    block_bytes = (2 * esz * (tq * C + 2 * S * C)       # double-buffered inputs
                   + 2 * esz * tq * C                   # output
                   + 4 * (tq * S + 2 * tq * C))         # f32 temporaries
    ce = pl.CostEstimate(
        flops=4 * B * num_heads * N * S * D,
        transcendentals=B * num_heads * N * S,
        bytes_accessed=esz * (2 * B * N * C + 2 * B * S * C * nj))
    return pl.pallas_call(
        kern,
        out_shape=jax.ShapeDtypeStruct((B, N, C), q_pack.dtype),
        grid=(B, nj),
        in_specs=[
            pl.BlockSpec((1, 1, tq, C), lambda b, j: (qi, b, j, 0)),
            pl.BlockSpec((1, 1, S, C), lambda b, j: (ki, b, 0, 0)),
            pl.BlockSpec((1, 1, S, C), lambda b, j: (vi, b, 0, 0)),
        ],
        out_specs=pl.BlockSpec((1, tq, C), lambda b, j: (b, j, 0)),
        compiler_params=pltpu.CompilerParams(
            dimension_semantics=("parallel", "parallel"),
            vmem_limit_bytes=_vmem_limit(block_bytes)),
        cost_estimate=ce,
    )(q_pack, k_pack, v_pack)


# ------------------------------- module wrapper -------------------------------

class AttentionPallas:
    """Mirrors models.modules.Attention(dim, num_heads, qkv_fuse=False,
    qkv_bias=False, attn_drop=0, proj_drop=0) forward in eval mode."""

    def __init__(self, dim, num_heads, out_dim=None, key=None,
                 dtype=jnp.float32):
        if out_dim is None:
            out_dim = dim
        self.dim = dim
        self.out_dim = out_dim
        self.num_heads = num_heads
        self.dtype = dtype
        head_dim = dim // num_heads
        self.scale = head_dim ** (-0.5)

        key = jax.random.PRNGKey(42) if key is None else key
        k1, k2, k3 = jax.random.split(key, 3)
        std = dim ** (-0.5)
        # Weights stored group-major (G, Cin, Cout): [Wq, Wk, Wv] — the
        # per-group tile is a BlockSpec index-map move (no lane slicing).
        self.w_qkv = (jax.random.normal(k1, (3, dim, dim), jnp.float32)
                      * std).astype(dtype)
        self.b_qkv = jnp.zeros((3, 1, dim), dtype)            # qkv_bias=False
        self.w_proj = (jax.random.normal(k2, (1, dim, out_dim), jnp.float32)
                       * std).astype(dtype)
        self.b_proj = (jax.random.normal(k3, (1, 1, out_dim), jnp.float32)
                       * 0.01).astype(dtype)
        # attn_drop / proj_drop are 0.0 (identity in eval) — omitted.

    def __call__(self, query, key=None, value=None, mask=None):
        # TODO(synk): additive-mask path (mask + softmax) not implemented.
        assert mask is None
        x = query.astype(self.dtype)
        B, N, _ = x.shape
        if key is None and value is None:
            # Self-attention: one fused QKV projection (activation read once);
            # attention reads the packed (3, B, N, C) tensor via BlockSpecs.
            qkv = packed_linear(x, self.w_qkv, self.b_qkv)        # (3, B, N, C)
            o = attention(qkv, qkv, qkv, 0, 1, 2,
                          scale=self.scale, num_heads=self.num_heads)
        else:
            if key is None:
                key = query
            kv_same = value is None or value is key
            if value is None:
                value = key
            kx = key.astype(self.dtype)
            q = packed_linear(x, self.w_qkv[:1], self.b_qkv[:1])  # (1, B, N, C)
            if kv_same:
                # Fused K+V projection: key activation read from HBM once.
                kv = packed_linear(kx, self.w_qkv[1:], self.b_qkv[1:])  # (2,B,S,C)
                o = attention(q, kv, kv, 0, 0, 1,
                              scale=self.scale, num_heads=self.num_heads)
            else:
                vx = value.astype(self.dtype)
                k_p = packed_linear(kx, self.w_qkv[1:2], self.b_qkv[1:2])
                v_p = packed_linear(vx, self.w_qkv[2:3], self.b_qkv[2:3])
                o = attention(q, k_p, v_p, 0, 0, 0,
                              scale=self.scale, num_heads=self.num_heads)
        out = packed_linear(o, self.w_proj, self.b_proj)          # (1, B, N, out)
        return out.reshape(B, N, self.out_dim)


# ---------------------------- reference (pure JAX) ----------------------------

def reference_forward(mod, query, key=None, value=None):
    f32 = jnp.float32
    if key is None:
        key = query
    if value is None:
        value = key
    x = query.astype(mod.dtype).astype(f32)
    kx = key.astype(mod.dtype).astype(f32)
    vx = value.astype(mod.dtype).astype(f32)
    B, N, _ = x.shape
    S = kx.shape[1]
    H, C = mod.num_heads, mod.dim
    D = C // H
    wq, wk, wv = (mod.w_qkv[i].astype(f32) for i in range(3))
    bq, bk, bv = (mod.b_qkv[i, 0].astype(f32) for i in range(3))
    wp = mod.w_proj[0].astype(f32)
    bp = mod.b_proj[0, 0].astype(f32)

    def split(t, L):
        return t.reshape(B, L, H, D).transpose(0, 2, 1, 3)

    q = split(x @ wq + bq, N)
    k = split(kx @ wk + bk, S)
    v = split(vx @ wv + bv, S)
    attn = jax.nn.softmax(jnp.einsum("bhnd,bhsd->bhns", q, k) * mod.scale, axis=-1)
    o = jnp.einsum("bhns,bhsd->bhnd", attn, v)
    o = o.transpose(0, 2, 1, 3).reshape(B, N, C)
    return o @ wp + bp


# ------------------------------------ main ------------------------------------

if __name__ == "__main__":
    B, N, C, H = 2, 8, 32, 4      # batch, seq, dim, heads (head_dim = 8)
    x = jax.random.normal(jax.random.PRNGKey(0), (B, N, C), jnp.float32)

    # --- f32 path ---
    mod = AttentionPallas(dim=C, num_heads=H, key=jax.random.PRNGKey(1),
                          dtype=jnp.float32)

    # Self-attention (fused QKV projection).
    out = jax.block_until_ready(mod(x))
    ref = reference_forward(mod, x)
    assert out.shape == (B, N, C), out.shape
    err = float(jnp.max(jnp.abs(out - ref)))
    assert err < 1e-2, err        # approx reciprocal -> slightly loosened

    # Cross-attention (key given, value defaults to key -> fused K+V), S != N.
    S = 16
    mem = jax.random.normal(jax.random.PRNGKey(2), (B, S, C), jnp.float32)
    out_x = jax.block_until_ready(mod(x, mem))
    ref_x = reference_forward(mod, x, mem)
    assert out_x.shape == (B, N, C), out_x.shape
    err_x = float(jnp.max(jnp.abs(out_x - ref_x)))
    assert err_x < 1e-2, err_x

    # --- bf16 storage / f32 accumulation path ---
    mod16 = AttentionPallas(dim=C, num_heads=H, key=jax.random.PRNGKey(1),
                            dtype=jnp.bfloat16)
    out16 = jax.block_until_ready(mod16(x)).astype(jnp.float32)
    ref16 = reference_forward(mod16, x)
    err16 = float(jnp.max(jnp.abs(out16 - ref16)))
    assert err16 < 2e-1, err16

    print("KERNEL_OK")
</pallas_src>

<mosaic_0001>
module attributes {stable_mosaic.version = 11 : i64} {
  func.func @_packed_linear_kernel(%arg0: i32, %arg1: i32, %arg2: i32, %arg3: i32, %arg4: memref<1x8x32xf32, #tpu.memory_space<vmem>>, %arg5: memref<1x32x32xf32, #tpu.memory_space<vmem>>, %arg6: memref<1x1x32xf32, #tpu.memory_space<vmem>>, %arg7: memref<1x1x8x32xf32, #tpu.memory_space<vmem>>) attributes {dimension_semantics = [#tpu.dimension_semantics<parallel>, #tpu.dimension_semantics<parallel>, #tpu.dimension_semantics<parallel>, #tpu.dimension_semantics<parallel>], iteration_bounds = array<i64: 3, 1, 2, 1>, scalar_prefetch = 0 : i64, scratch_operands = 0 : i64, tpu.core_type = #tpu.core_type<tc>, window_params = [{transform_indices = @transform_0, window_bounds = array<i64: 1, 8, 32>}, {transform_indices = @transform_1, window_bounds = array<i64: 1, 32, 32>}, {transform_indices = @transform_2, window_bounds = array<i64: 1, 1, 32>}, {transform_indices = @transform_3, window_bounds = array<i64: 1, 1, 8, 32>}]} {
    %c0 = arith.constant 0 : index
    %c0_0 = arith.constant 0 : index
    %c0_1 = arith.constant 0 : index
    %0 = vector.load %arg4[%c0, %c0_0, %c0_1] : memref<1x8x32xf32, #tpu.memory_space<vmem>>, vector<1x8x32xf32>
    %1 = vector.shape_cast %0 : vector<1x8x32xf32> to vector<8x32xf32>
    %c0_2 = arith.constant 0 : index
    %c0_3 = arith.constant 0 : index
    %c0_4 = arith.constant 0 : index
    %2 = vector.load %arg5[%c0_2, %c0_3, %c0_4] : memref<1x32x32xf32, #tpu.memory_space<vmem>>, vector<1x32x32xf32>
    %3 = vector.shape_cast %2 : vector<1x32x32xf32> to vector<32x32xf32>
    %cst = arith.constant dense<0.000000e+00> : vector<8x32xf32>
    %4 = tpu.matmul %1, %3, %cst {dimension_numbers = #tpu.dot_dimension_numbers<[1], [0], [0], [1], [0, 0, 1, 1], [], []>} : vector<8x32xf32>, vector<32x32xf32>, vector<8x32xf32> -> vector<8x32xf32>
    %c0_5 = arith.constant 0 : index
    %c0_6 = arith.constant 0 : index
    %c0_7 = arith.constant 0 : index
    %5 = vector.load %arg6[%c0_5, %c0_6, %c0_7] : memref<1x1x32xf32, #tpu.memory_space<vmem>>, vector<1x1x32xf32>
    %6 = vector.shape_cast %5 : vector<1x1x32xf32> to vector<1x32xf32>
    %7 = vector.broadcast %6 : vector<1x32xf32> to vector<8x32xf32>
    %8 = arith.addf %4, %7 : vector<8x32xf32>
    %c0_8 = arith.constant 0 : index
    %c0_9 = arith.constant 0 : index
    %c0_10 = arith.constant 0 : index
    %c0_11 = arith.constant 0 : index
    %9 = vector.load %arg7[%c0_8, %c0_9, %c0_10, %c0_11] : memref<1x1x8x32xf32, #tpu.memory_space<vmem>>, vector<1x1x8x32xf32>
    %10 = vector.shape_cast %9 : vector<1x1x8x32xf32> to vector<8x32xf32>
    %11 = vector.shape_cast %8 : vector<8x32xf32> to vector<1x1x8x32xf32>
    tpu.vector_store %arg7[%c0_8, %c0_9, %c0_10, %c0_11], %11 {strides = array<i32>} : memref<1x1x8x32xf32, #tpu.memory_space<vmem>>, vector<1x1x8x32xf32>,
    return
  }
  func.func @transform_0(%arg0: i32, %arg1: i32, %arg2: i32, %arg3: i32) -> (i32, i32, i32) {
    %c0_i32 = arith.constant 0 : i32
    %c0_i32_0 = arith.constant 0 : i32
    return %arg2, %arg3, %c0_i32 : i32, i32, i32
  }
  func.func @transform_1(%arg0: i32, %arg1: i32, %arg2: i32, %arg3: i32) -> (i32, i32, i32) {
    %c0_i32 = arith.constant 0 : i32
    %c0_i32_0 = arith.constant 0 : i32
    return %arg0, %c0_i32, %arg1 : i32, i32, i32
  }
  func.func @transform_2(%arg0: i32, %arg1: i32, %arg2: i32, %arg3: i32) -> (i32, i32, i32) {
    %c0_i32 = arith.constant 0 : i32
    %c0_i32_0 = arith.constant 0 : i32
    return %arg0, %c0_i32, %arg1 : i32, i32, i32
  }
  func.func @transform_3(%arg0: i32, %arg1: i32, %arg2: i32, %arg3: i32) -> (i32, i32, i32, i32) {
    %c0_i32 = arith.constant 0 : i32
    return %arg0, %arg2, %arg3, %arg1 : i32, i32, i32, i32
  }
}

</mosaic_0001>

<bundles_post_ra>
// kernel: tpu_custom_call.1
= control target key start
LH: loop header
LB: loop body
LE: loop exit
PB: predicated region body
PF: predicated region fallthrough
CT: control target
= control target key end

     0   :  { %s1277_s0 = inlined_call_operand.hbm [shape: f32[2,8,32], index: 0, kind: input, shape index: {}]   ;;  %s1278_s1 = inlined_call_operand.hbm [shape: f32[3,32,32], index: 1, kind: input, shape index: {}]   ;;  %s1279_s2 = inlined_call_operand.vmem [shape: f32[3,1,32], index: 2, kind: input, shape index: {}]   ;;  %s1280_s3 = inlined_call_operand.hbm [shape: f32[3,2,8,32], index: 3, kind: output, shape index: {}]  }
   0x1   :  { %1288 = sst [smem:[#allocation18_spill]] %s1277_s0 }
   0x2   :  { %8 = vsyncpa [#allocation3], 0 }
   0x3   :  { %10 = vsyncpa [#allocation3 + $0x1], 0 }
   0x4   :  { %11 = vsyncpa [#allocation6], 0 }
   0x5   :  { %13 = vsyncpa [#allocation6 + $0x1], 0 }
   0x6   :  { %14 = vsyncpa [#allocation4], 0 }
   0x7   :  { %16 = vsyncpa [#allocation4 + $0x1], 0  ;;  %s942_s12 = smov 0   ;;  %s944_s13 = smov 0  }
   0x8   :  { %s946_s14 = smov 0   ;;  %s948_s15 = smov 0  }
   0x9   :  { %s950_s16 = smov 0   ;;  %s952_s17 = smov 0  }
   0xa   :  { %s954_s18 = smov 0   ;;  %s956_s19 = smov 0  }
   0xb   :  { %s958_s20 = smov 0   ;;  %s960_s21 = smov 0  }
   0xc   :  { %s962_s22 = smov 0   ;;  %s964_s23 = smov 0  }
   0xd   :  { %s966_s24 = smov 0   ;;  %s968_s25 = smov 0  }
   0xe LB: > { %1289 = sst [smem:[#allocation11_spill]] %s904_s23  ;;  %s523_s26 = sadd.s32 4294967295, %s912_s25   ;;  %s912_s25 = sphi %s968_s25, %s22_s25   ;;  %s908_s24 = sphi %s966_s24, %s1320_s24   ;;  %s904_s23 = sphi %s964_s23, %s1319_s23   ;;  %s900_s22 = sphi %s962_s22, %s1318_s22   ;;  %s896_s21 = sphi %s960_s21, %s1317_s21   ;;  %s892_s20 = sphi %s958_s20, %s1329_s20   ;;  %s888_s19 = sphi %s956_s19, %s1328_s19   ;;  %s884_s18 = sphi %s954_s18, %s1327_s18   ;;  %s880_s17 = sphi %s952_s17, %s1326_s17   ;;  %s876_s16 = sphi %s950_s16, %s1325_s16   ;;  %s872_s15 = sphi %s948_s15, %s1324_s15   ;;  %s868_s14 = sphi %s946_s14, %s1323_s14   ;;  %s864_s13 = sphi %s944_s13, %s1322_s13   ;;  %s860_s12 = sphi %s942_s12, %s1321_s12  }
   0xf   : > { %1290 = sst [smem:[#allocation12_spill]] %s908_s24  ;;  %s40_s28 = sadd.s32 1, %s904_s23 }
  0x10   : > { %s48_s29 = sadd.s32 1, %s908_s24  ;;  %p42_p0 = scmp.ge.s32.totalorder %s40_s28, 2 }
  0x11   : > { %s57_s30 = sadd.s32 1, %s892_s20  ;;  %p64_p1 = scmp.ne.s32.totalorder %s892_s20, %s888_s19 }
  0x12   : > { %p65_p2 = scmp.eq.s32.totalorder %s912_s25, 0  ;;  %s1331_s28 = smov (%p42_p0, %s40_s28), 0 }
  0x13   : > { %1291 = sst [smem:[#allocation13_spill]] %s1331_s28  ;;  %s1333_s29 = smov (!%p42_p0, %s48_s29), %s908_s24 }
  0x14   : > { %s52_s4 = ssub.s32 %s904_s23, %s1331_s28  ;;  %p1025_p3 = por %p65_p2, %p64_p1 }
  0x15   : > { %p50_p4 = scmp.ge.s32.totalorder %s1333_s29, 3  ;;  %p55_p5 = scmp.eq.s32.totalorder %s52_s4, 0 }
  0x16   : > { %p70_p6 = scmp.ne.s32.totalorder %s888_s19, %s884_s18  ;;  %p71_p7 = scmp.eq.s32.totalorder %s523_s26, 0 }
  0x17   : > { %s1335_s29 = smov (%p50_p4, %s1333_s29), 0  ;;  %s85_s9 = sadd.s32 1, %s880_s17 }
  0x18   : > { %1293 = sst [smem:[#allocation14_spill]] %s1335_s29  ;;  %p1037_p8 = por %p71_p7, %p70_p6 }
  0x19   : > { %s1035_s6 = scalar_select %p55_p5, %s892_s20, %s57_s30  }
  0x1a   : > { %s1295_s7 = scalar_select %p1037_p8, 1, 0 }
  0x1b   : > { %1294 = sst [smem:[#allocation15_spill]] %s1035_s6  ;;  %s80_s8 = ssub.s32 %s908_s24, %s1335_s29 }
  0x1c   : > { %p83_p9 = scmp.eq.s32.totalorder %s80_s8, 0  ;;  %p92_p10 = scmp.ne.s32.totalorder %s880_s17, %s876_s16 }
  0x1d   : > { %p98_p11 = scmp.ne.s32.totalorder %s876_s16, %s872_s15  ;;  %s138_s30 = sor.u32 %s80_s8, %s52_s4 }
  0x1e   : > { %s1049_s10 = scalar_select %p83_p9, %s880_s17, %s85_s9  }
  0x1f   : > { %p1053_p12 = por %p92_p10, %p65_p2  ;;  %p1057_p13 = por %p98_p11, %p71_p7 }
  0x20   : > { %1296 = sst [smem:[#allocation16_spill]] %s1049_s10  ;;  %s145_s27 = sadd.s32 1, %s868_s14 }
  0x21   : > { %s1298_s18 = scalar_select %p1057_p13, 1, 0 }
  0x22   : > { %p143_p0 = scmp.eq.s32.totalorder %s138_s30, 0  ;;  %p155_p1 = scmp.ne.s32.totalorder %s868_s14, %s864_s13 }
  0x23   : > { %p156_p4 = scmp.eq.s32.totalorder %s523_s26, 5  ;;  %p161_p5 = scmp.ne.s32.totalorder %s864_s13, %s860_s12 }
  0x24   : > { %s1069_s15 = scalar_select %p143_p0, %s868_s14, %s145_s27  }
  0x25   : > { %p1071_p2 = por %p156_p4, %p155_p1  ;;  %s1301_s29 = sadd.s32 4294967294, %s912_s25  }
  0x26   : > { %1299 = sst [smem:[#allocation17_spill]] %s1069_s15  ;;  %p162_p6 = scmp.eq.s32.totalorder %s1301_s29, 5 }
  0x27   : > { %s1300_s9 = scalar_select %p1071_p2, 1, 0 }
  0x28   : > { %p583_p7 = scmp.lt.s32.totalorder %s912_s25, 6  ;;  %p1078_p9 = por %p162_p6, %p161_p5 }
  0x29   : > { %s182_s8 = sand.u32 1, %s892_s20   ;;  %s528_s28 = sshll.u32 %s904_s23, 7 }
  0x2a   : > { %s1302_s4 = scalar_select %p1078_p9, 1, 0 }
  0x2b   : > { %s527_s30 = sshll.u32 %s182_s8, 3  ;;  %s1303_s0 = sld [smem:[#allocation18_spill]] }
  0x2c   : > { %s186_s27 = scalar_lea.vmem [#allocation2], %s527_s30  ;;  %p1093_p10 = pnand %p583_p7, %p1025_p3 }
  0x2d   : > { %s194_s15 = sshll.u32 %s186_s27, 4  ;;  %p1099_p11 = pnand %p583_p7, %p1053_p12  ;;  %s1089_s15 = int_to_ptr.vmem [resolvable:$true] %s194_s15 }
  0x2e   : > { %p704_p5 = pneg %p1093_p10 }
  0x31   : > { %s1087_s10 = scalar_lea.hbm %s1303_s0, %s528_s28  ;;  %s183_s28 = scalar_lea.sflag [#allocation3], %s182_s8 }
  0x32   : > { %s702_s30 = scalar_lea.hbm %s1087_s10, 128  ;;  %s707_s11 = scalar_lea.hbm %s1303_s0, 256 }
  0x33   : > { %p703_p4 = scmp.ne.s32.totalorder %s1087_s10, %s702_s30  ;;  %p708_p12 = scmp.lt.u32.totalorder %s1087_s10, %s1303_s0 }
  0x34   : > { %p709_p7 = scmp.lt.u32.totalorder %s707_s11, %s702_s30  ;;  %p711_p1 = scmp.lt.u32.totalorder %s702_s30, %s1087_s10 }
  0x35   : > { %p705_p3 = pnand %p704_p5, %p703_p4 }
  0x36   : > { %p710_p0 = por %p709_p7, %p708_p12 }
  0x37   : > { %p706_p6 = pneg %p705_p3 }
  0x38   : > { %p712_p9 = por %p711_p1, %p710_p0 }
  0x3a   : > { %p713_p2 = pnand %p712_p9, %p706_p6 }
  0x3c   : > { %716 = shalt.err (!%p713_p2)
}
  0x3d   : > { %s717_s8 = scalar_lea.vmem %s1089_s15, 128  ;;  %s914_s5 = smov [#allocation2]  }
  0x3e   : > { %p718_p4 = scmp.ne.s32.totalorder %s1089_s15, %s717_s8  ;;  %s722_s26 = sshll.u32 %s914_s5, 4  ;;  %s723_s26 = int_to_ptr.vmem [resolvable:$false] %s722_s26 }
  0x3f   : > { %s724_s23 = scalar_lea.vmem %s723_s26, 256  ;;  %p725_p8 = scmp.lt.s32.totalorder %s1089_s15, %s723_s26 }
  0x40   : > { %p720_p3 = pnand %p718_p4, %p704_p5  ;;  %p726_p12 = scmp.lt.s32.totalorder %s724_s23, %s717_s8 }
  0x42   : > { %p721_p13 = pneg %p720_p3  ;;  %p727_p7 = por %p726_p12, %p725_p8 }
  0x44   : > { %p728_p0 = pnand %p727_p7, %p721_p13 }
  0x46   : > { %731 = shalt.err (!%p728_p0)
}
  0x47   : > { %575 = dma.hbm_to_vmem [thread:$0]  (!%p1093_p10), %s1087_s10, 128, %s1089_s15, %s183_s28  }
  0x48   : > { %p1306_p2 = scmp.lt.s32.totalorder %s912_s25, 7  ;;  %p1307_p9 = scmp.ge.s32.totalorder %s912_s25, 1 }
  0x49   : > { %s201_s11 = sand.u32 1, %s880_s17   ;;  %s543_s27 = sshll.u32 %s908_s24, 9 }
  0x4a   : > { %p1134_p1 = pnand %p1307_p9, %p1306_p2  ;;  %s529_s8 = sshll.u32 %s201_s11, 5 }
  0x4b   : > { %s1143_s26 = scalar_lea.hbm %s1278_s1, %s543_s27  ;;  %s205_s23 = scalar_lea.vmem [#allocation5], %s529_s8 }
  0x4c   : > { %s213_s10 = sshll.u32 %s205_s23, 4  ;;  %s1147_s15 = scalar_lea.sflag [#allocation6], %s201_s11  ;;  %s1145_s10 = int_to_ptr.vmem [resolvable:$true] %s213_s10 }
  0x4d   : > { %s732_s28 = scalar_lea.hbm %s1143_s26, 512  ;;  %p734_p13 = pneg %p1099_p11 }
  0x4e   : > { %p733_p8 = scmp.ne.s32.totalorder %s1143_s26, %s732_s28  ;;  %s737_s29 = scalar_lea.hbm %s1278_s1, 1536 }
  0x4f   : > { %p738_p6 = scmp.lt.u32.totalorder %s1143_s26, %s1278_s1  ;;  %p739_p4 = scmp.lt.u32.totalorder %s737_s29, %s732_s28 }
  0x50   : > { %p735_p10 = pnand %p734_p13, %p733_p8  ;;  %p741_p12 = scmp.lt.u32.totalorder %s732_s28, %s1143_s26 }
  0x51   : > { %p740_p3 = por %p739_p4, %p738_p6 }
  0x52   : > { %p736_p5 = pneg %p735_p10 }
  0x53   : > { %p742_p7 = por %p741_p12, %p740_p3 }
  0x55   : > { %p743_p0 = pnand %p742_p7, %p736_p5 }
  0x57   : > { %746 = shalt.err (!%p743_p0)
}
  0x58   : > { %s747_s11 = scalar_lea.vmem %s1145_s10, 512  ;;  %s915_s8 = smov [#allocation5]  }
  0x59   : > { %p748_p2 = scmp.ne.s32.totalorder %s1145_s10, %s747_s11  ;;  %s752_s23 = sshll.u32 %s915_s8, 4  ;;  %s753_s23 = int_to_ptr.vmem [resolvable:$false] %s752_s23 }
  0x5a   : > { %s754_s0 = scalar_lea.vmem %s753_s23, 1024  ;;  %p755_p10 = scmp.lt.s32.totalorder %s1145_s10, %s753_s23 }
  0x5b   : > { %p750_p9 = pnand %p748_p2, %p734_p13  ;;  %p756_p6 = scmp.lt.s32.totalorder %s754_s0, %s747_s11 }
  0x5d   : > { %p751_p8 = pneg %p750_p9  ;;  %p757_p4 = por %p756_p6, %p755_p10 }
  0x5f   : > { %p758_p3 = pnand %p757_p4, %p751_p8 }
  0x61   : > { %761 = shalt.err (!%p758_p3)
}
  0x62   : > { %s916_s24 = smov 128   ;;  %s917_s28 = smov 8  }
  0x63   : > { %578 = dma.hbm_to_vmem [thread:$0]  (!%p1099_p11), %s1143_s26, 512, %s1145_s10, %s1147_s15, %s916_s24, %s916_s24, %s917_s28  }
  0x64   : > { %234 = sbr.rel (%p1134_p1) target bundleno = 350 (0x15e), region = 32  ;;  %s236_s27 = sand.u32 (!%p1134_p1), 1, %s888_s19  }
  0x65   : > { %s533_s5 = sshll.u32 (!%p1134_p1), %s236_s27, 3  ;;  %s237_s29 = scalar_lea.sflag (!%p1134_p1), [#allocation3], %s236_s27 }
  0x66   : > { %s240_s11 = scalar_lea.vmem (!%p1134_p1), [#allocation2], %s533_s5  ;;  %p1309_p13 = scmp.ne.s32.totalorder (!%p1134_p1), %s1295_s7, 0 }
  0x6b   : > { %847 = dma.done.wait (%p1309_p13), %s237_s29, 128  }
  0x6c   : > { %849 = vsyncadd (%p1309_p13), %s237_s29, 4294967168  ;;  %s245_s8 = sand.u32 1, %s876_s16   ;;  %p1310_p11 = scmp.ne.s32.totalorder %s1298_s18, 0 }
  0x6d   : > { %s534_s23 = sshll.u32 %s245_s8, 5  ;;  %s246_s6 = scalar_lea.sflag [#allocation6], %s245_s8 }
  0x6e   : > { %s249_s26 = scalar_lea.vmem [#allocation5], %s534_s23 }
  0x6f   : > { %851 = dma.done.wait (%p1310_p11), %s246_s6, 512  }
  0x70   : > { %853 = vsyncadd (%p1310_p11), %s246_s6, 4294966784  ;;  %v918_v0 = vmov 0.0|0.0   ;;  %vm919_vm0 = vmmov 0   ;;  %v920_v1 = vmov 0.0   ;;  %v290_v2 = vld [vmem:[%s249_s26] sm:$0xff]  ;;  %v291_v3 = vld [vmem:[%s249_s26 + $0x8] sm:$0xff] }
  0x71   : > { %560 = vmatprep.subr.bf16.mxu0 %v918_v0  ;;  %557 = vmatprep.mubr.msk.f32.mxu0 %vm919_vm0, %v920_v1  ;;  %v292_v4 = vld [vmem:[%s249_s26 + $0x10] sm:$0xff]  ;;  %v561_v5 = vpack.c.bf16 %v291_v3, %v290_v2  ;;  %v293_v6 = vld [vmem:[%s249_s26 + $0x18] sm:$0xff]  ;;  %vm301_vm1 = vcmask 261120   ;;  %p283_p1 = scmp.lt.s32.totalorder %s900_s22, 2  ;;  %s280_s7 = sand.u32 1, %s864_s13  }
  0x72   : > { %v564_v7 = vpack.c.bf16 %v293_v6, %v292_v4  ;;  %v289_v8 = vld [vmem:[%s240_s11] sm:$0xff]  ;;  %s535_s30 = sshll.u32 %s280_s7, 3  ;;  %s539_s10 = sshll.u32 %s900_s22, 1 }
  0x73   : > { %562 = vmatpush3.bf16.msra.mxu0 %v561_v5  ;;  %s284_s18 = scalar_select %p283_p1, %s900_s22, 2 }
  0x74   : > { %563 = vmatprep.subr.bf16.mxu0 %v918_v0  ;;  %s390_s28 = sadd.s32 %s896_s21, %s539_s10  ;;  %s282_s5 = scalar_lea.vmem [#allocation7], %s535_s30 }
  0x75   : > { %s288_s24 = scalar_lea.vmem %s1279_s2, %s284_s18  ;;  %s540_s27 = sshll.u32 %s390_s28, 7 }
  0x76   : > { %v536_v9 = vld [vmem:[%s288_s24] ss:$0 sm:$0xff]  ;;  %s394_s29 = sshll.u32 %s282_s5, 4  ;;  %s1199_s23 = scalar_lea.hbm %s1280_s3, %s540_s27  ;;  %s1201_s29 = int_to_ptr.vmem [resolvable:$true] %s394_s29 }
  0x77   : > { %565 = vmatpush3.bf16.msra.mxu0 %v564_v7  ;;  %s377_s21 = scalar_lea.sflag [#allocation4], %s280_s7  ;;  %s762_s22 = scalar_lea.vmem %s1201_s29, 128 }
  0x78   : > { %p763_p5 = scmp.ne.s32.totalorder %s1201_s29, %s762_s22  ;;  %p1311_p12 = scmp.ne.s32.totalorder %s1300_s9, 0 }
  0x79   : > { %s921_s6 = smov [#allocation7]  }
  0x7a   : > { %558 = vmatmul.mubr.msk.f32.vlgmr.msra.gmra.mrb[0].mxu0 %vm301_vm1, %v289_v8  ;;  %p764_p7 = pnand %p763_p5, %p1311_p12  ;;  %s766_s26 = sshll.u32 %s921_s6, 4  ;;  %s767_s26 = int_to_ptr.vmem [resolvable:$false] %s766_s26 }
  0x7b   : > { %s768_s18 = scalar_lea.vmem %s767_s26, 256  ;;  %p769_p2 = scmp.lt.s32.totalorder %s1201_s29, %s767_s26 }
  0x7c   : > { %p765_p0 = pneg %p764_p7  ;;  %p770_p9 = scmp.lt.s32.totalorder %s768_s18, %s762_s22 }
  0x7e   : > { %p771_p8 = por %p770_p9, %p769_p2 }
  0x80   : > { %p772_p10 = pnand %p771_p8, %p765_p0 }
 0x14d   : > { %v371_v10 = vpop.f32.mrb[0].mxu0 }
 0x14e   : > { %v372_v11 = vadd.f32 %v536_v9, %v371_v10  ;;  %v559_v12 = vpop.f32.mrb[1].mxu0 }
 0x150   : > { %375 = vst.msk [vmem:[%s282_s5] sm:$0xff] %vm301_vm1, %v372_v11 }
 0x151   : > { %775 = shalt.err (!%p772_p10)
}
 0x152   : > { %s776_s7 = scalar_lea.hbm %s1199_s23, 128  ;;  %s780_s15 = scalar_lea.hbm %s1280_s3, 768 }
 0x153   : > { %p777_p6 = scmp.ne.s32.totalorder %s1199_s23, %s776_s7  ;;  %p781_p13 = scmp.lt.u32.totalorder %s1199_s23, %s1280_s3 }
 0x154   : > { %p782_p11 = scmp.lt.u32.totalorder %s780_s15, %s776_s7  ;;  %p784_p5 = scmp.lt.u32.totalorder %s776_s7, %s1199_s23 }
 0x155   : > { %p778_p4 = pnand %p777_p6, %p1311_p12 }
 0x156   : > { %p783_p1 = por %p782_p11, %p781_p13 }
 0x157   : > { %p779_p3 = pneg %p778_p4 }
 0x158   : > { %p785_p7 = por %p784_p5, %p783_p1 }
 0x15a   : > { %p786_p0 = pnand %p785_p7, %p779_p3 }
 0x15c   : > { %789 = shalt.err (!%p786_p0)
}
 0x15d   : > { %570 = dma.vmem_to_hbm [thread:$0]  (%p1311_p12), %s1201_s29, 128, %s1199_s23, %s377_s21  }
 0x15e PF: > { %p584_p2 = scmp.ge.s32.totalorder %s912_s25, 2  ;;  %s406_s28 = sand.u32 1, %s860_s12  }
 0x15f   : > { %p1312_p9 = scmp.ne.s32.totalorder %s1302_s4, 0  ;;  %s407_s27 = scalar_lea.sflag [#allocation4], %s406_s28 }
 0x161   : > { %p580_p8 = pnand %p584_p2, %p1312_p9 }
 0x163   : > { %855 = dma.done.wait (!%p580_p8), %s407_s27, 128  }
 0x164   : > { %857 = vsyncadd (!%p580_p8), %s407_s27, 4294967168  ;;  %s22_s25 = sadd.s32 1, %s912_s25   ;;  %s1314_s9 = sld [smem:[#allocation17_spill]] }
 0x165   : > { %p1230_p10 = scmp.ge.s32.totalorder %s22_s25, 8   ;;  %s1315_s29 = sld [smem:[#allocation16_spill]] }
 0x166   : > { %s1316_s11 = sld [smem:[#allocation15_spill]]  ;;  %s1317_s21 = sld [smem:[#allocation11_spill]] }
 0x167   : > { %s1318_s22 = sld [smem:[#allocation12_spill]]  ;;  %s1319_s23 = sld [smem:[#allocation13_spill]] }
 0x168   : > { %s1320_s24 = sld [smem:[#allocation14_spill]]  ;;  %s1321_s12 = smov %s864_s13 }
 0x169   : > { %s1322_s13 = smov %s868_s14  ;;  %s1324_s15 = smov %s876_s16 }
 0x16a   : > { %s1323_s14 = smov %s1314_s9  ;;  %s1325_s16 = smov %s880_s17 }
 0x16b   : > { %s1326_s17 = smov %s1315_s29  ;;  %s1327_s18 = smov %s888_s19 }
 0x16c   : > { %s1328_s19 = smov %s892_s20  ;;  %s1329_s20 = smov %s1316_s11 }
 0x16d   :  { %21 = sbr.rel (!%p1230_p10) target bundleno = 14 (0xe), region = 93 }
 0x174   :  { %412 = vsyncpa [#allocation3], 1 }
 0x175   :  { %414 = vsyncpa [#allocation3 + $0x1], 1 }
 0x176   :  { %415 = vsyncpa [#allocation6], 1 }
 0x177   :  { %417 = vsyncpa [#allocation6 + $0x1], 1 }
 0x178   :  { %418 = vsyncpa [#allocation4], 1 }
 0x179   :  { %420 = vsyncpa [#allocation4 + $0x1], 1 }

</bundles_post_ra>
